<compile_context>
chip_gen: v7x
topology: tpu7x:2x2x1
jax: 0.10.0
libtpu: 0.0.40
codegen_flags: <defaults>
</compile_context>

<pallas_src>
import math
from functools import partial

import jax
import jax.numpy as jnp
from jax.experimental import pallas as pl
from jax.experimental.pallas import tpu as pltpu


def _maxpool_kernel(x_ref, o_ref, xp_ref, *, k, sw, fpad_h, fpad_w, mp_pad,
                    h, w, h_out, w_out):
    # x_ref : (h, w, blk)         unpadded input block, (n*c)-block on lanes
    # o_ref : (h_out, w_out, blk)
    # xp_ref: (hp, wp, blk)       VMEM scratch holding the padded tile
    hp, wp, blk = xp_ref.shape
    dt = x_ref.dtype
    ph = fpad_h + mp_pad    # total top/bottom pad rows
    pw = fpad_w + mp_pad    # total left/right pad cols

    # ---- build the padded tile in VMEM (fuses F.pad + MaxPool2d padding) ----
    # F.pad zero border bands (only the borders are written, not the full tile).
    if ph > 0:
        xp_ref[0:ph, :, :] = jnp.zeros((ph, wp, blk), dt)
        xp_ref[ph + h:hp, :, :] = jnp.zeros((hp - ph - h, wp, blk), dt)
    if pw > 0:
        xp_ref[:, 0:pw, :] = jnp.zeros((hp, pw, blk), dt)
        xp_ref[:, pw + w:wp, :] = jnp.zeros((hp, wp - pw - w, blk), dt)
    # nn.MaxPool2d's own `padding` pads with -inf; written after the zeros so the
    # outermost ring (including corners) ends up -inf, matching PyTorch exactly.
    if mp_pad > 0:
        xp_ref[0:mp_pad, :, :] = jnp.full((mp_pad, wp, blk), -jnp.inf, dt)
        xp_ref[hp - mp_pad:hp, :, :] = jnp.full((mp_pad, wp, blk), -jnp.inf, dt)
        xp_ref[:, 0:mp_pad, :] = jnp.full((hp, mp_pad, blk), -jnp.inf, dt)
        xp_ref[:, wp - mp_pad:wp, :] = jnp.full((hp, mp_pad, blk), -jnp.inf, dt)
    # Real data in the interior.
    xp_ref[ph:ph + h, pw:pw + w, :] = x_ref[...]

    # ---- separable max reduction ----
    # W reduction (stride sw): read the k shifted copies directly at the strided
    # output columns.  Stride lands on the sublane dim (cheap); lanes contiguous.
    def w_slice(kw):
        if sw == 1:
            return xp_ref[:, pl.ds(kw, w_out), :]
        return xp_ref[:, pl.ds(kw, w_out, sw), :]

    rm = w_slice(0)                       # acc initialized from first window
    for kw in range(1, k):
        rm = jnp.maximum(rm, w_slice(kw))

    # H reduction (stride 1): leading-dim slices of the row-max value.
    out = rm[0:h_out]
    for kh in range(1, k):
        out = jnp.maximum(out, rm[kh:kh + h_out])

    o_ref[...] = out


def _pick_block_nc(nc, h, w, hp, wp, h_out, w_out, itemsize,
                   target_bytes=12 * 1024 * 1024):
    """Lane-block size over the fused (n*c) axis.

    Sized so double-buffered in/out blocks plus the padded scratch stay well
    under the default scoped-VMEM limit (safe on v7x's 64 MiB VMEM as well),
    while being a multiple of 128 lanes for dense, unmasked vector stores.
    """
    per_lane = (2 * (h * w + h_out * w_out) + hp * wp) * itemsize
    blk = (target_bytes // max(per_lane, 1)) // 128 * 128
    blk = max(128, int(blk))
    if nc <= blk:
        return nc          # tiny problems: one block covering every (n, c) slice
    return blk


def maxpool_forward(x, kernel_size, stride, padding=0):
    """Pallas implementation of the MaxPool module's forward pass. x: (N, C, H, W)."""
    n, c, h, w = x.shape
    k = int(kernel_size)
    sw = int(stride)
    mp_pad = int(padding)

    # Same padding math as the PyTorch forward (float division + math.ceil).
    r = math.ceil(((k - 1) / 2) / 2)   # F.pad left/right (W)
    b = math.ceil(((k - 1) / 2) / 2)   # F.pad top/bottom (H)

    hp = h + 2 * (b + mp_pad)
    wp = w + 2 * (r + mp_pad)
    h_out = hp - k + 1                 # H stride is always 1 in this module
    w_out = (wp - k) // sw + 1

    nc = n * c
    # Layout plumbing only (no pad pass): put the batch-like (n*c) axis last so
    # it maps to lanes inside the kernel.
    xt = jnp.transpose(x.reshape(nc, h, w), (1, 2, 0))   # (h, w, nc)

    blk = _pick_block_nc(nc, h, w, hp, wp, h_out, w_out, x.dtype.itemsize)
    grid = (pl.cdiv(nc, blk),)

    kernel = partial(_maxpool_kernel, k=k, sw=sw, fpad_h=b, fpad_w=r,
                     mp_pad=mp_pad, h=h, w=w, h_out=h_out, w_out=w_out)

    out = pl.pallas_call(
        kernel,
        out_shape=jax.ShapeDtypeStruct((h_out, w_out, nc), x.dtype),
        grid=grid,
        in_specs=[pl.BlockSpec((h, w, blk), lambda i: (0, 0, i))],
        out_specs=pl.BlockSpec((h_out, w_out, blk), lambda i: (0, 0, i)),
        scratch_shapes=[pltpu.VMEM((hp, wp, blk), x.dtype)],
        compiler_params=pltpu.CompilerParams(dimension_semantics=("parallel",)),
    )(xt)

    # Back to PyTorch's NCHW output layout.
    return jnp.transpose(out, (2, 0, 1)).reshape(n, c, h_out, w_out)


if __name__ == "__main__":
    # Module config consistent with its constructor: MaxPool(kernel_size=3, stride=2)
    kernel_size, stride, padding = 3, 2, 0

    key = jax.random.PRNGKey(0)
    x = jax.random.normal(key, (2, 4, 16, 16), dtype=jnp.float32)

    out = maxpool_forward(x, kernel_size, stride, padding)
    out = jax.block_until_ready(out)

    # Pure-JAX reference (same padding math + max pooling) for a correctness check.
    r = math.ceil(((kernel_size - 1) / 2) / 2)
    b = math.ceil(((kernel_size - 1) / 2) / 2)
    xp = jnp.pad(x, ((0, 0), (0, 0), (b, b), (r, r)))
    ref = jax.lax.reduce_window(
        xp, -jnp.inf, jax.lax.max,
        window_dimensions=(1, 1, kernel_size, kernel_size),
        window_strides=(1, 1, 1, stride),
        padding="VALID")

    assert out.shape == (2, 4, 16, 8), out.shape
    assert out.dtype == x.dtype
    assert jnp.allclose(out, ref), "Pallas maxpool mismatch vs reference"
    print("KERNEL_OK")
</pallas_src>

<mosaic_0001>
module attributes {stable_mosaic.version = 11 : i64} {
  func.func @_maxpool_kernel(%arg0: i32, %arg1: memref<16x16x8xf32, #tpu.memory_space<vmem>>, %arg2: memref<16x8x8xf32, #tpu.memory_space<vmem>>, %arg3: memref<18x18x8xf32, #tpu.memory_space<vmem>>) attributes {dimension_semantics = [#tpu.dimension_semantics<parallel>], iteration_bounds = array<i64: 1>, scalar_prefetch = 0 : i64, scratch_operands = 1 : i64, tpu.core_type = #tpu.core_type<tc>, window_params = [{transform_indices = @transform_0, window_bounds = array<i64: 16, 16, 8>}, {transform_indices = @transform_1, window_bounds = array<i64: 16, 8, 8>}]} {
    %cst = arith.constant 0.000000e+00 : f32
    %0 = vector.broadcast %cst : f32 to vector<1x18x8xf32>
    %c0 = arith.constant 0 : index
    %c0_0 = arith.constant 0 : index
    %c0_1 = arith.constant 0 : index
    %1 = vector.load %arg3[%c0, %c0_0, %c0_1] : memref<18x18x8xf32, #tpu.memory_space<vmem>>, vector<1x18x8xf32>
    tpu.vector_store %arg3[%c0, %c0_0, %c0_1], %0 {strides = array<i32>} : memref<18x18x8xf32, #tpu.memory_space<vmem>>, vector<1x18x8xf32>,
    %cst_2 = arith.constant 0.000000e+00 : f32
    %2 = vector.broadcast %cst_2 : f32 to vector<1x18x8xf32>
    %c17 = arith.constant 17 : index
    %c0_3 = arith.constant 0 : index
    %c0_4 = arith.constant 0 : index
    %3 = vector.load %arg3[%c17, %c0_3, %c0_4] : memref<18x18x8xf32, #tpu.memory_space<vmem>>, vector<1x18x8xf32>
    tpu.vector_store %arg3[%c17, %c0_3, %c0_4], %2 {strides = array<i32>} : memref<18x18x8xf32, #tpu.memory_space<vmem>>, vector<1x18x8xf32>,
    %cst_5 = arith.constant 0.000000e+00 : f32
    %4 = vector.broadcast %cst_5 : f32 to vector<18x1x8xf32>
    %c0_6 = arith.constant 0 : index
    %c0_7 = arith.constant 0 : index
    %c0_8 = arith.constant 0 : index
    %5 = vector.load %arg3[%c0_6, %c0_7, %c0_8] : memref<18x18x8xf32, #tpu.memory_space<vmem>>, vector<18x1x8xf32>
    tpu.vector_store %arg3[%c0_6, %c0_7, %c0_8], %4 {strides = array<i32>} : memref<18x18x8xf32, #tpu.memory_space<vmem>>, vector<18x1x8xf32>,
    %cst_9 = arith.constant 0.000000e+00 : f32
    %6 = vector.broadcast %cst_9 : f32 to vector<18x1x8xf32>
    %c0_10 = arith.constant 0 : index
    %c17_11 = arith.constant 17 : index
    %c0_12 = arith.constant 0 : index
    %7 = vector.load %arg3[%c0_10, %c17_11, %c0_12] : memref<18x18x8xf32, #tpu.memory_space<vmem>>, vector<18x1x8xf32>
    tpu.vector_store %arg3[%c0_10, %c17_11, %c0_12], %6 {strides = array<i32>} : memref<18x18x8xf32, #tpu.memory_space<vmem>>, vector<18x1x8xf32>,
    %c0_13 = arith.constant 0 : index
    %c0_14 = arith.constant 0 : index
    %c0_15 = arith.constant 0 : index
    %8 = vector.load %arg1[%c0_13, %c0_14, %c0_15] : memref<16x16x8xf32, #tpu.memory_space<vmem>>, vector<16x16x8xf32>
    %c1 = arith.constant 1 : index
    %c1_16 = arith.constant 1 : index
    %c0_17 = arith.constant 0 : index
    %9 = vector.load %arg3[%c1, %c1_16, %c0_17] : memref<18x18x8xf32, #tpu.memory_space<vmem>>, vector<16x16x8xf32>
    tpu.vector_store %arg3[%c1, %c1_16, %c0_17], %8 {strides = array<i32>} : memref<18x18x8xf32, #tpu.memory_space<vmem>>, vector<16x16x8xf32>,
    %c0_18 = arith.constant 0 : index
    %c0_19 = arith.constant 0 : index
    %c0_20 = arith.constant 0 : index
    %10 = tpu.strided_load %arg3[%c0_18, %c0_19, %c0_20] {strides = array<i32: 1, 2, 1>} : memref<18x18x8xf32, #tpu.memory_space<vmem>>, vector<18x8x8xf32>
    %c0_21 = arith.constant 0 : index
    %c1_22 = arith.constant 1 : index
    %c0_23 = arith.constant 0 : index
    %11 = tpu.strided_load %arg3[%c0_21, %c1_22, %c0_23] {strides = array<i32: 1, 2, 1>} : memref<18x18x8xf32, #tpu.memory_space<vmem>>, vector<18x8x8xf32>
    %12 = arith.maximumf %10, %11 : vector<18x8x8xf32>
    %c0_24 = arith.constant 0 : index
    %c2 = arith.constant 2 : index
    %c0_25 = arith.constant 0 : index
    %13 = tpu.strided_load %arg3[%c0_24, %c2, %c0_25] {strides = array<i32: 1, 2, 1>} : memref<18x18x8xf32, #tpu.memory_space<vmem>>, vector<18x8x8xf32>
    %14 = arith.maximumf %12, %13 : vector<18x8x8xf32>
    %15 = vector.extract_strided_slice %14 {offsets = [0, 0, 0], sizes = [16, 8, 8], strides = [1, 1, 1]} : vector<18x8x8xf32> to vector<16x8x8xf32>
    %16 = vector.extract_strided_slice %14 {offsets = [1, 0, 0], sizes = [16, 8, 8], strides = [1, 1, 1]} : vector<18x8x8xf32> to vector<16x8x8xf32>
    %17 = arith.maximumf %15, %16 : vector<16x8x8xf32>
    %18 = vector.extract_strided_slice %14 {offsets = [2, 0, 0], sizes = [16, 8, 8], strides = [1, 1, 1]} : vector<18x8x8xf32> to vector<16x8x8xf32>
    %19 = arith.maximumf %17, %18 : vector<16x8x8xf32>
    %c0_26 = arith.constant 0 : index
    %c0_27 = arith.constant 0 : index
    %c0_28 = arith.constant 0 : index
    %20 = vector.load %arg2[%c0_26, %c0_27, %c0_28] : memref<16x8x8xf32, #tpu.memory_space<vmem>>, vector<16x8x8xf32>
    tpu.vector_store %arg2[%c0_26, %c0_27, %c0_28], %19 {strides = array<i32>} : memref<16x8x8xf32, #tpu.memory_space<vmem>>, vector<16x8x8xf32>,
    return
  }
  func.func @transform_0(%arg0: i32) -> (i32, i32, i32) {
    %c0_i32 = arith.constant 0 : i32
    %c0_i32_0 = arith.constant 0 : i32
    %c0_i32_1 = arith.constant 0 : i32
    return %c0_i32, %c0_i32_0, %arg0 : i32, i32, i32
  }
  func.func @transform_1(%arg0: i32) -> (i32, i32, i32) {
    %c0_i32 = arith.constant 0 : i32
    %c0_i32_0 = arith.constant 0 : i32
    %c0_i32_1 = arith.constant 0 : i32
    return %c0_i32, %c0_i32_0, %arg0 : i32, i32, i32
  }
}

</mosaic_0001>

<bundles_post_ra>
// kernel: tpu_custom_call.1
= control target key start
LH: loop header
LB: loop body
LE: loop exit
PB: predicated region body
PF: predicated region fallthrough
CT: control target
= control target key end

     0   :  { %vm8_vm0 = vcmask 64512   ;;  %vm11_vm1 = vcmask 58368   ;;  %vm17_vm2 = vcmask 57344   ;;  %v315_v0 = vmov 0.0   ;;  %s540_s0 = inlined_call_operand.vmem [shape: f32[16,16,8], index: 0, kind: input, shape index: {}]   ;;  %s541_s1 = inlined_call_operand.vmem [shape: f32[16,8,8], index: 1, kind: output, shape index: {}]  }
   0x1   :  { %9 = vst.msk [vmem:[#allocation2] sm:$0xff] %vm8_vm0, %v315_v0  ;;  %10 = vst.msk [vmem:[#allocation2 + $0x8] sm:$0xff] %vm8_vm0, %v315_v0  ;;  %v54_v1 = vld [vmem:[%s540_s0] sm:$0xff]  ;;  %v55_v2 = vld [vmem:[%s540_s0 + $0x8] sm:$0xff] }
   0x2   :  { %14 = vst.msk [vmem:[#allocation2 + $0x198] sm:$0xff] %vm8_vm0, %v315_v0  ;;  %15 = vst.msk [vmem:[#allocation2 + $0x1a0] sm:$0xff] %vm8_vm0, %v315_v0  ;;  %v56_v3 = vld [vmem:[%s540_s0 + $0x10] sm:$0xff]  ;;  %v57_v4 = vld [vmem:[%s540_s0 + $0x18] sm:$0xff] }
   0x3   :  { %12 = vst.msk [vmem:[#allocation2 + $0x10] sm:$0x3] %vm11_vm1, %v315_v0  ;;  %16 = vst.msk [vmem:[#allocation2 + $0x1a8] sm:$0x3] %vm11_vm1, %v315_v0  ;;  %v58_v5 = vld [vmem:[%s540_s0 + $0x20] sm:$0xff]  ;;  %v59_v6 = vld [vmem:[%s540_s0 + $0x28] sm:$0xff] }
   0x4   :  { %19 = vst.msk [vmem:[#allocation2 + $0x18] sm:$0x1] %vm17_vm2, %v315_v0  ;;  %20 = vst.msk [vmem:[#allocation2 + $0x30] sm:$0x1] %vm17_vm2, %v315_v0  ;;  %v60_v7 = vld [vmem:[%s540_s0 + $0x30] sm:$0xff]  ;;  %v61_v8 = vld [vmem:[%s540_s0 + $0x38] sm:$0xff] }
   0x5   :  { %21 = vst.msk [vmem:[#allocation2 + $0x48] sm:$0x1] %vm17_vm2, %v315_v0  ;;  %22 = vst.msk [vmem:[#allocation2 + $0x60] sm:$0x1] %vm17_vm2, %v315_v0  ;;  %v62_v9 = vld [vmem:[%s540_s0 + $0x40] sm:$0xff]  ;;  %v63_v10 = vld [vmem:[%s540_s0 + $0x48] sm:$0xff] }
   0x6   :  { %23 = vst.msk [vmem:[#allocation2 + $0x78] sm:$0x1] %vm17_vm2, %v315_v0  ;;  %24 = vst.msk [vmem:[#allocation2 + $0x90] sm:$0x1] %vm17_vm2, %v315_v0  ;;  %v64_v11 = vld [vmem:[%s540_s0 + $0x50] sm:$0xff]  ;;  %v65_v12 = vld [vmem:[%s540_s0 + $0x58] sm:$0xff] }
   0x7   :  { %25 = vst.msk [vmem:[#allocation2 + $0xa8] sm:$0x1] %vm17_vm2, %v315_v0  ;;  %26 = vst.msk [vmem:[#allocation2 + $0xc0] sm:$0x1] %vm17_vm2, %v315_v0  ;;  %v66_v13 = vld [vmem:[%s540_s0 + $0x60] sm:$0xff]  ;;  %v67_v14 = vld [vmem:[%s540_s0 + $0x68] sm:$0xff] }
   0x8   :  { %27 = vst.msk [vmem:[#allocation2 + $0xd8] sm:$0x1] %vm17_vm2, %v315_v0  ;;  %28 = vst.msk [vmem:[#allocation2 + $0xf0] sm:$0x1] %vm17_vm2, %v315_v0  ;;  %v68_v15 = vld [vmem:[%s540_s0 + $0x70] sm:$0xff]  ;;  %v69_v16 = vld [vmem:[%s540_s0 + $0x78] sm:$0xff] }
   0x9   :  { %29 = vst.msk [vmem:[#allocation2 + $0x108] sm:$0x1] %vm17_vm2, %v315_v0  ;;  %30 = vst.msk [vmem:[#allocation2 + $0x120] sm:$0x1] %vm17_vm2, %v315_v0  ;;  %v70_v17 = vld [vmem:[%s540_s0 + $0x80] sm:$0xff]  ;;  %v71_v18 = vld [vmem:[%s540_s0 + $0x88] sm:$0xff] }
   0xa   :  { %31 = vst.msk [vmem:[#allocation2 + $0x138] sm:$0x1] %vm17_vm2, %v315_v0  ;;  %32 = vst.msk [vmem:[#allocation2 + $0x150] sm:$0x1] %vm17_vm2, %v315_v0  ;;  %v72_v19 = vld [vmem:[%s540_s0 + $0x90] sm:$0xff]  ;;  %v73_v20 = vld [vmem:[%s540_s0 + $0x98] sm:$0xff] }
   0xb   :  { %33 = vst.msk [vmem:[#allocation2 + $0x168] sm:$0x1] %vm17_vm2, %v315_v0  ;;  %34 = vst.msk [vmem:[#allocation2 + $0x180] sm:$0x1] %vm17_vm2, %v315_v0  ;;  %v74_v21 = vld [vmem:[%s540_s0 + $0xa0] sm:$0xff]  ;;  %v75_v22 = vld [vmem:[%s540_s0 + $0xa8] sm:$0xff] }
   0xc   :  { %18 = vst.msk [vmem:[#allocation2] sm:$0x1] %vm17_vm2, %v315_v0  ;;  %35 = vst.msk [vmem:[#allocation2 + $0x198] sm:$0x1] %vm17_vm2, %v315_v0  ;;  %v76_v23 = vld [vmem:[%s540_s0 + $0xb0] sm:$0xff]  ;;  %v77_v24 = vld [vmem:[%s540_s0 + $0xb8] sm:$0xff] }
   0xd   :  { %87 = vst.msk [vmem:[#allocation2 + $0x19] sm:$0xff] %vm8_vm0, %v54_v1  ;;  %88 = vst.msk [vmem:[#allocation2 + $0x21] sm:$0xff] %vm8_vm0, %v55_v2  ;;  %v78_v25 = vld [vmem:[%s540_s0 + $0xc0] sm:$0xff]  ;;  %v79_v26 = vld [vmem:[%s540_s0 + $0xc8] sm:$0xff] }
   0xe   :  { %89 = vst.msk [vmem:[#allocation2 + $0x31] sm:$0xff] %vm8_vm0, %v56_v3  ;;  %90 = vst.msk [vmem:[#allocation2 + $0x39] sm:$0xff] %vm8_vm0, %v57_v4  ;;  %v80_v27 = vld [vmem:[%s540_s0 + $0xd0] sm:$0xff]  ;;  %v81_v28 = vld [vmem:[%s540_s0 + $0xd8] sm:$0xff] }
   0xf   :  { %91 = vst.msk [vmem:[#allocation2 + $0x49] sm:$0xff] %vm8_vm0, %v58_v5  ;;  %92 = vst.msk [vmem:[#allocation2 + $0x51] sm:$0xff] %vm8_vm0, %v59_v6  ;;  %v82_v29 = vld [vmem:[%s540_s0 + $0xe0] sm:$0xff]  ;;  %v83_v30 = vld [vmem:[%s540_s0 + $0xe8] sm:$0xff] }
  0x10   :  { %93 = vst.msk [vmem:[#allocation2 + $0x61] sm:$0xff] %vm8_vm0, %v60_v7  ;;  %94 = vst.msk [vmem:[#allocation2 + $0x69] sm:$0xff] %vm8_vm0, %v61_v8  ;;  %v84_v31 = vld [vmem:[%s540_s0 + $0xf0] sm:$0xff]  ;;  %v85_v32 = vld [vmem:[%s540_s0 + $0xf8] sm:$0xff] }
  0x11   :  { %95 = vst.msk [vmem:[#allocation2 + $0x79] sm:$0xff] %vm8_vm0, %v62_v9  ;;  %96 = vst.msk [vmem:[#allocation2 + $0x81] sm:$0xff] %vm8_vm0, %v63_v10  ;;  %v155_v36 = vld [vmem:[#allocation2 + $0x1] ss:$2 sm:$0xff]  ;;  %v209_v42 = vld [vmem:[#allocation2 + $0x2] ss:$2 sm:$0xff] }
  0x12   :  { %97 = vst.msk [vmem:[#allocation2 + $0x91] sm:$0xff] %vm8_vm0, %v64_v11  ;;  %98 = vst.msk [vmem:[#allocation2 + $0x99] sm:$0xff] %vm8_vm0, %v65_v12 }
  0x13   :  { %99 = vst.msk [vmem:[#allocation2 + $0xa9] sm:$0xff] %vm8_vm0, %v66_v13  ;;  %100 = vst.msk [vmem:[#allocation2 + $0xb1] sm:$0xff] %vm8_vm0, %v67_v14  ;;  %v119_v33 = vld [vmem:[#allocation2] ss:$2 sm:$0xff] }
  0x14   :  { %101 = vst.msk [vmem:[#allocation2 + $0xc1] sm:$0xff] %vm8_vm0, %v68_v15  ;;  %102 = vst.msk [vmem:[#allocation2 + $0xc9] sm:$0xff] %vm8_vm0, %v69_v16  ;;  %v121_v34 = vld [vmem:[#allocation2 + $0x18] ss:$2 sm:$0xff]  ;;  %v157_v37 = vld [vmem:[#allocation2 + $0x19] ss:$2 sm:$0xff]  ;;  %v190_v39 = vmax.f32 %v119_v33, %v155_v36 }
  0x15   :  { %103 = vst.msk [vmem:[#allocation2 + $0xd9] sm:$0xff] %vm8_vm0, %v70_v17  ;;  %104 = vst.msk [vmem:[#allocation2 + $0xe1] sm:$0xff] %vm8_vm0, %v71_v18  ;;  %v123_v35 = vld [vmem:[#allocation2 + $0x30] ss:$2 sm:$0xff]  ;;  %v159_v38 = vld [vmem:[#allocation2 + $0x31] ss:$2 sm:$0xff]  ;;  %v191_v40 = vmax.f32 %v121_v34, %v157_v37 }
  0x16   :  { %105 = vst.msk [vmem:[#allocation2 + $0xf1] sm:$0xff] %vm8_vm0, %v72_v19  ;;  %106 = vst.msk [vmem:[#allocation2 + $0xf9] sm:$0xff] %vm8_vm0, %v73_v20  ;;  %v192_v41 = vmax.f32 %v123_v35, %v159_v38  ;;  %v211_v43 = vld [vmem:[#allocation2 + $0x1a] ss:$2 sm:$0xff]  ;;  %v244_v46 = vmax.f32 %v190_v39, %v209_v42  ;;  %v161_v47 = vld [vmem:[#allocation2 + $0x49] ss:$2 sm:$0xff] }
  0x17   :  { %107 = vst.msk [vmem:[#allocation2 + $0x109] sm:$0xff] %vm8_vm0, %v74_v21  ;;  %108 = vst.msk [vmem:[#allocation2 + $0x111] sm:$0xff] %vm8_vm0, %v75_v22  ;;  %v125_v44 = vld [vmem:[#allocation2 + $0x48] ss:$2 sm:$0xff]  ;;  %v245_v49 = vmax.f32 %v191_v40, %v211_v43  ;;  %v163_v52 = vld [vmem:[#allocation2 + $0x61] ss:$2 sm:$0xff] }
  0x18   :  { %109 = vst.msk [vmem:[#allocation2 + $0x121] sm:$0xff] %vm8_vm0, %v76_v23  ;;  %110 = vst.msk [vmem:[#allocation2 + $0x129] sm:$0xff] %vm8_vm0, %v77_v24  ;;  %v213_v45 = vld [vmem:[#allocation2 + $0x32] ss:$2 sm:$0xff]  ;;  %v193_v51 = vmax.f32 %v125_v44, %v161_v47  ;;  %v165_v56 = vld [vmem:[#allocation2 + $0x79] ss:$2 sm:$0xff] }
  0x19   :  { %111 = vst.msk [vmem:[#allocation2 + $0x139] sm:$0xff] %vm8_vm0, %v78_v25  ;;  %112 = vst.msk [vmem:[#allocation2 + $0x141] sm:$0xff] %vm8_vm0, %v79_v26  ;;  %v127_v48 = vld [vmem:[#allocation2 + $0x60] ss:$2 sm:$0xff]  ;;  %v246_v50 = vmax.f32 %v192_v41, %v213_v45  ;;  %v131_v57 = vld [vmem:[#allocation2 + $0x90] ss:$2 sm:$0xff]  ;;  %v262_v58 = vmax.f32 %v244_v46, %v245_v49 }
  0x1a   :  { %113 = vst.msk [vmem:[#allocation2 + $0x151] sm:$0xff] %vm8_vm0, %v80_v27  ;;  %114 = vst.msk [vmem:[#allocation2 + $0x159] sm:$0xff] %vm8_vm0, %v81_v28  ;;  %v129_v53 = vld [vmem:[#allocation2 + $0x78] ss:$2 sm:$0xff]  ;;  %v194_v55 = vmax.f32 %v127_v48, %v163_v52  ;;  %v167_v63 = vld [vmem:[#allocation2 + $0x91] ss:$2 sm:$0xff] }
  0x1b   :  { %115 = vst.msk [vmem:[#allocation2 + $0x169] sm:$0xff] %vm8_vm0, %v82_v29  ;;  %116 = vst.msk [vmem:[#allocation2 + $0x171] sm:$0xff] %vm8_vm0, %v83_v30  ;;  %v215_v54 = vld [vmem:[#allocation2 + $0x4a] ss:$2 sm:$0xff]  ;;  %v263_v60 = vmax.f32 %v245_v49, %v246_v50  ;;  %v195_v62 = vmax.f32 %v129_v53, %v165_v56  ;;  %v219_v2 = vld [vmem:[#allocation2 + $0x7a] ss:$2 sm:$0xff]  ;;  %v196_v3 = vmax.f32 %v131_v57, %v167_v63 }
  0x1c   :  { %117 = vst.msk [vmem:[#allocation2 + $0x181] sm:$0xff] %vm8_vm0, %v84_v31  ;;  %118 = vst.msk [vmem:[#allocation2 + $0x189] sm:$0xff] %vm8_vm0, %v85_v32  ;;  %v247_v59 = vmax.f32 %v193_v51, %v215_v54  ;;  %v217_v61 = vld [vmem:[#allocation2 + $0x62] ss:$2 sm:$0xff]  ;;  %v169_v4 = vld [vmem:[#allocation2 + $0xa9] ss:$2 sm:$0xff]  ;;  %v278_v6 = vmax.f32 %v262_v58, %v246_v50 }
  0x1d   :  { %v133_v0 = vld [vmem:[#allocation2 + $0xa8] ss:$2 sm:$0xff]  ;;  %v248_v1 = vmax.f32 %v194_v55, %v217_v61  ;;  %v249_v9 = vmax.f32 %v195_v62, %v219_v2  ;;  %v171_v11 = vld [vmem:[#allocation2 + $0xc1] ss:$2 sm:$0xff]  ;;  %v137_v12 = vld [vmem:[#allocation2 + $0xd8] ss:$2 sm:$0xff] }
  0x1e   :  { %v135_v5 = vld [vmem:[#allocation2 + $0xc0] ss:$2 sm:$0xff]  ;;  %v279_v7 = vmax.f32 %v263_v60, %v247_v59  ;;  %v264_v8 = vmax.f32 %v246_v50, %v247_v59  ;;  %v197_v15 = vmax.f32 %v133_v0, %v169_v4  ;;  %v173_v18 = vld [vmem:[#allocation2 + $0xd9] ss:$2 sm:$0xff]  ;;  %v139_v19 = vld [vmem:[#allocation2 + $0xf0] ss:$2 sm:$0xff] }
  0x1f   :  { %v221_v10 = vld [vmem:[#allocation2 + $0x92] ss:$2 sm:$0xff]  ;;  %v265_v13 = vmax.f32 %v247_v59, %v248_v1  ;;  %v198_v17 = vmax.f32 %v135_v5, %v171_v11  ;;  %294 = vst.msk [vmem:[%s541_s1] sm:$0xff] %vm8_vm0, %v278_v6  ;;  %v266_v21 = vmax.f32 %v248_v1, %v249_v9  ;;  %v225_v22 = vld [vmem:[#allocation2 + $0xc2] ss:$2 sm:$0xff]  ;;  %v199_v23 = vmax.f32 %v137_v12, %v173_v18 }
  0x20   :  { %v250_v14 = vmax.f32 %v196_v3, %v221_v10  ;;  %v223_v16 = vld [vmem:[#allocation2 + $0xaa] ss:$2 sm:$0xff]  ;;  %295 = vst.msk [vmem:[%s541_s1 + $0x8] sm:$0xff] %vm8_vm0, %v279_v7  ;;  %v280_v20 = vmax.f32 %v264_v8, %v248_v1  ;;  %v175_v24 = vld [vmem:[#allocation2 + $0xf1] ss:$2 sm:$0xff] }
  0x21   :  { %v141_v25 = vld [vmem:[#allocation2 + $0x108] ss:$2 sm:$0xff]  ;;  %v281_v26 = vmax.f32 %v265_v13, %v249_v9  ;;  %v251_v27 = vmax.f32 %v197_v15, %v223_v16  ;;  %v252_v29 = vmax.f32 %v198_v17, %v225_v22  ;;  %v177_v31 = vld [vmem:[#allocation2 + $0x109] ss:$2 sm:$0xff]  ;;  %v200_v35 = vmax.f32 %v139_v19, %v175_v24  ;;  %v145_v39 = vld [vmem:[#allocation2 + $0x138] ss:$2 sm:$0xff] }
  0x22   :  { %v267_v28 = vmax.f32 %v249_v9, %v250_v14  ;;  %v227_v30 = vld [vmem:[#allocation2 + $0xda] ss:$2 sm:$0xff]  ;;  %296 = vst.msk [vmem:[%s541_s1 + $0x10] sm:$0xff] %vm8_vm0, %v280_v20  ;;  %v282_v33 = vmax.f32 %v266_v21, %v250_v14  ;;  %v201_v37 = vmax.f32 %v141_v25, %v177_v31  ;;  %v179_v38 = vld [vmem:[#allocation2 + $0x121] ss:$2 sm:$0xff] }
  0x23   :  { %v143_v32 = vld [vmem:[#allocation2 + $0x120] ss:$2 sm:$0xff]  ;;  %v253_v34 = vmax.f32 %v199_v23, %v227_v30  ;;  %297 = vst.msk [vmem:[%s541_s1 + $0x18] sm:$0xff] %vm8_vm0, %v281_v26  ;;  %v268_v41 = vmax.f32 %v250_v14, %v251_v27  ;;  %v269_v42 = vmax.f32 %v251_v27, %v252_v29  ;;  %v181_v45 = vld [vmem:[#allocation2 + $0x139] ss:$2 sm:$0xff] }
  0x24   :  { %v229_v36 = vld [vmem:[#allocation2 + $0xf2] ss:$2 sm:$0xff]  ;;  %v283_v40 = vmax.f32 %v267_v28, %v251_v27  ;;  %v202_v44 = vmax.f32 %v143_v32, %v179_v38  ;;  %298 = vst.msk [vmem:[%s541_s1 + $0x20] sm:$0xff] %vm8_vm0, %v282_v33  ;;  %v233_v50 = vld [vmem:[#allocation2 + $0x122] ss:$2 sm:$0xff]  ;;  %v203_v51 = vmax.f32 %v145_v39, %v181_v45 }
  0x25   :  { %v231_v43 = vld [vmem:[#allocation2 + $0x10a] ss:$2 sm:$0xff]  ;;  %v254_v47 = vmax.f32 %v200_v35, %v229_v36  ;;  %v270_v48 = vmax.f32 %v252_v29, %v253_v34  ;;  %v183_v52 = vld [vmem:[#allocation2 + $0x151] ss:$2 sm:$0xff]  ;;  %v284_v54 = vmax.f32 %v268_v41, %v252_v29  ;;  %v285_v55 = vmax.f32 %v269_v42, %v253_v34  ;;  %v235_v57 = vld [vmem:[#allocation2 + $0x13a] ss:$2 sm:$0xff] }
  0x26   :  { %v147_v46 = vld [vmem:[#allocation2 + $0x150] ss:$2 sm:$0xff]  ;;  %v255_v49 = vmax.f32 %v201_v37, %v231_v43  ;;  %299 = vst.msk [vmem:[%s541_s1 + $0x28] sm:$0xff] %vm8_vm0, %v283_v40  ;;  %v256_v56 = vmax.f32 %v202_v44, %v233_v50  ;;  %v185_v59 = vld [vmem:[#allocation2 + $0x169] ss:$2 sm:$0xff]  ;;  %v257_v0 = vmax.f32 %v203_v51, %v235_v57 }
  0x27   :  { %v149_v53 = vld [vmem:[#allocation2 + $0x168] ss:$2 sm:$0xff]  ;;  %v204_v58 = vmax.f32 %v147_v46, %v183_v52  ;;  %v286_v61 = vmax.f32 %v270_v48, %v254_v47  ;;  %v271_v62 = vmax.f32 %v253_v34, %v254_v47  ;;  %v187_v2 = vld [vmem:[#allocation2 + $0x181] ss:$2 sm:$0xff]  ;;  %v153_v3 = vld [vmem:[#allocation2 + $0x198] ss:$2 sm:$0xff] }
  0x28   :  { %v151_v60 = vld [vmem:[#allocation2 + $0x180] ss:$2 sm:$0xff]  ;;  %v272_v63 = vmax.f32 %v254_v47, %v255_v49  ;;  %300 = vst.msk [vmem:[%s541_s1 + $0x30] sm:$0xff] %vm8_vm0, %v284_v54  ;;  %301 = vst.msk [vmem:[%s541_s1 + $0x38] sm:$0xff] %vm8_vm0, %v285_v55  ;;  %v273_v4 = vmax.f32 %v255_v49, %v256_v56  ;;  %v205_v6 = vmax.f32 %v149_v53, %v185_v59  ;;  %v189_v8 = vld [vmem:[#allocation2 + $0x199] ss:$2 sm:$0xff] }
  0x29   :  { %v237_v1 = vld [vmem:[#allocation2 + $0x152] ss:$2 sm:$0xff]  ;;  %v206_v7 = vmax.f32 %v151_v60, %v187_v2  ;;  %302 = vst.msk [vmem:[%s541_s1 + $0x40] sm:$0xff] %vm8_vm0, %v286_v61  ;;  %v287_v9 = vmax.f32 %v271_v62, %v255_v49  ;;  %v274_v11 = vmax.f32 %v256_v56, %v257_v0  ;;  %v241_v13 = vld [vmem:[#allocation2 + $0x182] ss:$2 sm:$0xff]  ;;  %v207_v14 = vmax.f32 %v153_v3, %v189_v8 }
  0x2a   :  { %v258_v5 = vmax.f32 %v204_v58, %v237_v1  ;;  %v288_v10 = vmax.f32 %v272_v63, %v256_v56  ;;  %v239_v12 = vld [vmem:[#allocation2 + $0x16a] ss:$2 sm:$0xff]  ;;  %v243_v15 = vld [vmem:[#allocation2 + $0x19a] ss:$2 sm:$0xff]  ;;  %v289_v16 = vmax.f32 %v273_v4, %v257_v0 }
  0x2b   :  { %v259_v17 = vmax.f32 %v205_v6, %v239_v12  ;;  %v260_v19 = vmax.f32 %v206_v7, %v241_v13  ;;  %303 = vst.msk [vmem:[%s541_s1 + $0x48] sm:$0xff] %vm8_vm0, %v287_v9  ;;  %v261_v23 = vmax.f32 %v207_v14, %v243_v15 }
  0x2c   :  { %v275_v18 = vmax.f32 %v257_v0, %v258_v5  ;;  %304 = vst.msk [vmem:[%s541_s1 + $0x50] sm:$0xff] %vm8_vm0, %v288_v10  ;;  %v290_v20 = vmax.f32 %v274_v11, %v258_v5  ;;  %305 = vst.msk [vmem:[%s541_s1 + $0x58] sm:$0xff] %vm8_vm0, %v289_v16 }
  0x2d   :  { %v276_v22 = vmax.f32 %v258_v5, %v259_v17  ;;  %v277_v24 = vmax.f32 %v259_v17, %v260_v19 }
  0x2e   :  { %v291_v21 = vmax.f32 %v275_v18, %v259_v17  ;;  %306 = vst.msk [vmem:[%s541_s1 + $0x60] sm:$0xff] %vm8_vm0, %v290_v20 }
  0x2f   :  { %v292_v25 = vmax.f32 %v276_v22, %v260_v19  ;;  %v293_v26 = vmax.f32 %v277_v24, %v261_v23 }
  0x30   :  { %307 = vst.msk [vmem:[%s541_s1 + $0x68] sm:$0xff] %vm8_vm0, %v291_v21 }
  0x31   :  { %308 = vst.msk [vmem:[%s541_s1 + $0x70] sm:$0xff] %vm8_vm0, %v292_v25  ;;  %309 = vst.msk [vmem:[%s541_s1 + $0x78] sm:$0xff] %vm8_vm0, %v293_v26 }

</bundles_post_ra>
